<compile_context>
chip_gen: v5e
topology: v5e:2x2
jax: 0.10.0
libtpu: 0.0.40
codegen_flags: <defaults>
</compile_context>

<pallas_src>
import functools

import jax
import jax.numpy as jnp
from jax import lax
from jax.experimental import pallas as pl
from jax.experimental.pallas import tpu as pltpu


def _policy_net_kernel(x_ref, w1_ref, b1_ref, w2_ref, b2_ref, out_ref, *, action_dim):
    """Fused fc1 -> relu -> fc2 -> softmax for one batch tile.

    x_ref  : (TB, S)  batch-major input tile (streamed over the grid)
    w1_ref : (H, S)   fc1 weight, (out, in) layout (resident in VMEM)
    b1_ref : (H, 1)
    w2_ref : (H, A)   fc2 weight  — or (H, 1) logit-difference when A == 2
    b2_ref : (1, A)   fc2 bias    — or (1, 1) bias difference   when A == 2
    out_ref: (TB, A)  probabilities, batch-major
    """
    x = x_ref[...]  # (TB, S), already f32

    # fc1 + ReLU, computed feature-major so the big batch dim sits on lanes:
    # (H, S) x (TB, S) contracted over S -> (H, TB)   (lane-dense intermediate)
    h = lax.dot_general(
        w1_ref[...], x,
        dimension_numbers=(((1,), (1,)), ((), ())),
        preferred_element_type=jnp.float32,
    )
    h = jnp.maximum(h + b1_ref[...], 0.0)  # (H, TB)

    if action_dim == 2:
        # softmax over two logits == sigmoid of their difference.  w2/b2 hold
        # the precomputed (col1 - col0) difference, so this is one matvec plus
        # two direct column stores: no concat, no reduce, no divide.
        d = lax.dot_general(
            h, w2_ref[...],
            dimension_numbers=(((0,), (0,)), ((), ())),
            preferred_element_type=jnp.float32,
        )  # (TB, 1)
        p1 = 1.0 / (1.0 + jnp.exp(-(d + b2_ref[...])))  # EUP exp
        out_ref[:, 0:1] = (1.0 - p1).astype(out_ref.dtype)
        out_ref[:, 1:2] = p1.astype(out_ref.dtype)
    else:
        # General A: batch-major logits (TB, A); numerically stable softmax
        # along the tiny lane axis with an EXACT divide (fixes the sandbox
        # failure caused by approx reciprocal).
        logits = lax.dot_general(
            h, w2_ref[...],
            dimension_numbers=(((0,), (0,)), ((), ())),
            preferred_element_type=jnp.float32,
        )  # (TB, A)
        logits = logits + b2_ref[...]
        m = jnp.max(logits, axis=1, keepdims=True)
        e = jnp.exp(logits - m)
        out = e / jnp.sum(e, axis=1, keepdims=True)
        out_ref[...] = out.astype(out_ref.dtype)


def _round_up(v, m):
    return ((v + m - 1) // m) * m


def _pick_batch_tile(B, tile_b):
    """Batch tile: <= tile_b, sublane-aligned when tiling, >= 2 tiles for big B."""
    tb = min(int(tile_b), B)
    if B > 2048:
        # Ensure at least 2 grid tiles so ("parallel",) feeds both v7x TCs.
        tb = min(tb, _round_up(pl.cdiv(B, 2), 8))
    if tb < B:
        tb = max(8, (tb // 8) * 8)  # second-to-last block dim must be 8-aligned
    return tb


def policy_net_forward(x, w1, b1, w2, b2, *, tile_b=8192):
    """x: (B, S) f32; w1: (S, H); b1: (H,); w2: (H, A); b2: (A,)  ->  (B, A)."""
    B, S = x.shape
    H = w1.shape[1]
    A = w2.shape[1]

    x = jnp.asarray(x, jnp.float32)                      # (B, S), no HBM transpose
    w1t = jnp.asarray(w1, jnp.float32).T                 # (H, S)  tiny, one-time
    b1c = jnp.asarray(b1, jnp.float32).reshape(H, 1)     # (H, 1)

    if A == 2:
        w2f = jnp.asarray(w2, jnp.float32)
        b2f = jnp.asarray(b2, jnp.float32)
        w2k = (w2f[:, 1] - w2f[:, 0]).reshape(H, 1)      # hoisted logit-diff weight
        b2k = (b2f[1] - b2f[0]).reshape(1, 1)
    else:
        w2k = jnp.asarray(w2, jnp.float32)               # (H, A)
        b2k = jnp.asarray(b2, jnp.float32).reshape(1, A)

    tb = _pick_batch_tile(B, tile_b)
    grid = (pl.cdiv(B, tb),)

    kernel = functools.partial(_policy_net_kernel, action_dim=A)

    out = pl.pallas_call(
        kernel,
        out_shape=jax.ShapeDtypeStruct((B, A), jnp.float32),
        grid=grid,
        in_specs=[
            pl.BlockSpec((tb, S), lambda i: (i, 0)),         # x streams over batch rows
            pl.BlockSpec((H, S), lambda i: (0, 0)),          # weights / biases stay
            pl.BlockSpec((H, 1), lambda i: (0, 0)),          #   resident in VMEM
            pl.BlockSpec(w2k.shape, lambda i: (0, 0)),       #   (constant index_map,
            pl.BlockSpec(b2k.shape, lambda i: (0, 0)),       #    never re-DMA'd)
        ],
        out_specs=pl.BlockSpec((tb, A), lambda i: (i, 0)),
        compiler_params=pltpu.CompilerParams(
            dimension_semantics=("parallel",),               # megacore sharding on v7x
            # Narrow (tb,S)/(tb,A) blocks pad to 128 lanes in VMEM and are
            # double-buffered; raise the scoped-VMEM limit (v5e default 16 MiB)
            # while staying under v7x's 64 MiB physical VMEM.
            vmem_limit_bytes=48 * 1024 * 1024,
        ),
    )(x, w1t, b1c, w2k, b2k)

    return out  # (B, A) — no wrapper transpose


def reference_forward(x, w1, b1, w2, b2):
    h = jnp.maximum(x @ w1 + b1, 0.0)
    logits = h @ w2 + b2
    return jax.nn.softmax(logits, axis=1)


def init_params(key, state_dim, action_dim, hidden_dim):
    """Deterministic init mimicking nn.Linear's U(-1/sqrt(fan_in), 1/sqrt(fan_in))."""
    k1, k2, k3, k4 = jax.random.split(key, 4)
    lim1 = 1.0 / jnp.sqrt(jnp.float32(state_dim))
    lim2 = 1.0 / jnp.sqrt(jnp.float32(hidden_dim))
    w1 = jax.random.uniform(k1, (state_dim, hidden_dim), jnp.float32, -lim1, lim1)
    b1 = jax.random.uniform(k2, (hidden_dim,), jnp.float32, -lim1, lim1)
    w2 = jax.random.uniform(k3, (hidden_dim, action_dim), jnp.float32, -lim2, lim2)
    b2 = jax.random.uniform(k4, (action_dim,), jnp.float32, -lim2, lim2)
    return w1, b1, w2, b2


if __name__ == "__main__":
    # Use high-precision matmuls for both kernel and reference so the
    # correctness comparison is apples-to-apples on real TPUs.
    jax.config.update("jax_default_matmul_precision", "highest")

    key = jax.random.PRNGKey(0)
    kx, kp, kx2, kp2, kx3 = jax.random.split(key, 5)

    # Test 1: CartPole-like shapes (S=4, H=32, A=2), small batch -> sigmoid path.
    state_dim, hidden_dim, action_dim = 4, 32, 2
    batch = 8
    x = jax.random.normal(kx, (batch, state_dim), jnp.float32)
    w1, b1, w2, b2 = init_params(kp, state_dim, action_dim, hidden_dim)

    out = jax.block_until_ready(policy_net_forward(x, w1, b1, w2, b2))
    ref = reference_forward(x, w1, b1, w2, b2)
    assert out.shape == (batch, action_dim)
    assert jnp.allclose(out, ref, atol=1e-4, rtol=1e-4)
    assert jnp.allclose(jnp.sum(out, axis=1), 1.0, atol=1e-5)

    # Test 2: general-A softmax path (A=3) with a multi-step pipelined grid and
    # a remainder tile (B=300, tile_b=64 -> 5 grid steps, last one partial).
    action_dim2, batch2 = 3, 300
    x2 = jax.random.normal(kx2, (batch2, state_dim), jnp.float32)
    w1b, b1b, w2b, b2b = init_params(kp2, state_dim, action_dim2, hidden_dim)
    out2 = jax.block_until_ready(
        policy_net_forward(x2, w1b, b1b, w2b, b2b, tile_b=64))
    ref2 = reference_forward(x2, w1b, b1b, w2b, b2b)
    assert out2.shape == (batch2, action_dim2)
    assert jnp.allclose(out2, ref2, atol=1e-4, rtol=1e-4)
    assert jnp.allclose(jnp.sum(out2, axis=1), 1.0, atol=1e-5)

    # Test 3: larger batch with the default tile -> exercises the automatic
    # >=2-tile split (v7x megacore) and 8-aligned remainder handling.
    batch3 = 3000
    x3 = jax.random.normal(kx3, (batch3, state_dim), jnp.float32)
    out3 = jax.block_until_ready(policy_net_forward(x3, w1, b1, w2, b2))
    ref3 = reference_forward(x3, w1, b1, w2, b2)
    assert out3.shape == (batch3, action_dim)
    assert jnp.allclose(out3, ref3, atol=1e-4, rtol=1e-4)
    assert jnp.allclose(jnp.sum(out3, axis=1), 1.0, atol=1e-5)

    print("KERNEL_OK")
</pallas_src>

<mosaic_0001>
module attributes {stable_mosaic.version = 11 : i64} {
  func.func @_policy_net_kernel(%arg0: i32, %arg1: memref<8x4xf32, #tpu.memory_space<vmem>>, %arg2: memref<32x4xf32, #tpu.memory_space<vmem>>, %arg3: memref<32x1xf32, #tpu.memory_space<vmem>>, %arg4: memref<32x1xf32, #tpu.memory_space<vmem>>, %arg5: memref<1x1xf32, #tpu.memory_space<vmem>>, %arg6: memref<8x2xf32, #tpu.memory_space<vmem>>) attributes {dimension_semantics = [#tpu.dimension_semantics<parallel>], iteration_bounds = array<i64: 1>, scalar_prefetch = 0 : i64, scratch_operands = 0 : i64, tpu.core_type = #tpu.core_type<tc>, window_params = [{transform_indices = @transform_0, window_bounds = array<i64: 8, 4>}, {pipeline_mode = #tpu.pipeline_mode<synchronous>, transform_indices = @transform_1, window_bounds = array<i64: 32, 4>}, {pipeline_mode = #tpu.pipeline_mode<synchronous>, transform_indices = @transform_2, window_bounds = array<i64: 32, 1>}, {pipeline_mode = #tpu.pipeline_mode<synchronous>, transform_indices = @transform_3, window_bounds = array<i64: 32, 1>}, {pipeline_mode = #tpu.pipeline_mode<synchronous>, transform_indices = @transform_4, window_bounds = array<i64: 1, 1>}, {transform_indices = @transform_5, window_bounds = array<i64: 8, 2>}]} {
    %c0 = arith.constant 0 : index
    %c0_0 = arith.constant 0 : index
    %0 = vector.load %arg1[%c0, %c0_0] : memref<8x4xf32, #tpu.memory_space<vmem>>, vector<8x4xf32>
    %c0_1 = arith.constant 0 : index
    %c0_2 = arith.constant 0 : index
    %1 = vector.load %arg2[%c0_1, %c0_2] : memref<32x4xf32, #tpu.memory_space<vmem>>, vector<32x4xf32>
    %cst = arith.constant dense<0.000000e+00> : vector<32x8xf32>
    %2 = tpu.matmul %1, %0, %cst {dimension_numbers = #tpu.dot_dimension_numbers<[1], [1], [0], [0], [0, 0, 1, 0], [], []>, precision = #tpu.contract_precision<fp32>} : vector<32x4xf32>, vector<8x4xf32>, vector<32x8xf32> -> vector<32x8xf32>
    %c0_3 = arith.constant 0 : index
    %c0_4 = arith.constant 0 : index
    %3 = vector.load %arg3[%c0_3, %c0_4] : memref<32x1xf32, #tpu.memory_space<vmem>>, vector<32x1xf32>
    %4 = vector.broadcast %3 : vector<32x1xf32> to vector<32x8xf32>
    %5 = arith.addf %2, %4 : vector<32x8xf32>
    %cst_5 = arith.constant 0.000000e+00 : f32
    %6 = vector.broadcast %cst_5 : f32 to vector<32x8xf32>
    %7 = arith.maximumf %5, %6 : vector<32x8xf32>
    %c0_6 = arith.constant 0 : index
    %c0_7 = arith.constant 0 : index
    %8 = vector.load %arg4[%c0_6, %c0_7] : memref<32x1xf32, #tpu.memory_space<vmem>>, vector<32x1xf32>
    %cst_8 = arith.constant dense<0.000000e+00> : vector<8x1xf32>
    %9 = tpu.matmul %7, %8, %cst_8 {dimension_numbers = #tpu.dot_dimension_numbers<[0], [0], [1], [1], [0, 1, 1, 1], [], []>, precision = #tpu.contract_precision<fp32>} : vector<32x8xf32>, vector<32x1xf32>, vector<8x1xf32> -> vector<8x1xf32>
    %c0_9 = arith.constant 0 : index
    %c0_10 = arith.constant 0 : index
    %10 = vector.load %arg5[%c0_9, %c0_10] : memref<1x1xf32, #tpu.memory_space<vmem>>, vector<1x1xf32>
    %11 = vector.broadcast %10 : vector<1x1xf32> to vector<8x1xf32>
    %12 = arith.addf %9, %11 : vector<8x1xf32>
    %cst_11 = arith.constant 0.000000e+00 : f32
    %13 = vector.broadcast %cst_11 : f32 to vector<8x1xf32>
    %14 = arith.subf %13, %12 : vector<8x1xf32>
    %15 = math.exp %14 : vector<8x1xf32>
    %cst_12 = arith.constant 1.000000e+00 : f32
    %16 = vector.broadcast %cst_12 : f32 to vector<8x1xf32>
    %17 = arith.addf %16, %15 : vector<8x1xf32>
    %cst_13 = arith.constant 1.000000e+00 : f32
    %18 = vector.broadcast %cst_13 : f32 to vector<8x1xf32>
    %19 = arith.divf %18, %17 : vector<8x1xf32>
    %cst_14 = arith.constant 1.000000e+00 : f32
    %20 = vector.broadcast %cst_14 : f32 to vector<8x1xf32>
    %21 = arith.subf %20, %19 : vector<8x1xf32>
    %c0_15 = arith.constant 0 : index
    %c0_16 = arith.constant 0 : index
    %22 = vector.load %arg6[%c0_15, %c0_16] : memref<8x2xf32, #tpu.memory_space<vmem>>, vector<8x1xf32>
    tpu.vector_store %arg6[%c0_15, %c0_16], %21 {strides = array<i32>} : memref<8x2xf32, #tpu.memory_space<vmem>>, vector<8x1xf32>,
    %c0_17 = arith.constant 0 : index
    %c1 = arith.constant 1 : index
    %23 = vector.load %arg6[%c0_17, %c1] : memref<8x2xf32, #tpu.memory_space<vmem>>, vector<8x1xf32>
    tpu.vector_store %arg6[%c0_17, %c1], %19 {strides = array<i32>} : memref<8x2xf32, #tpu.memory_space<vmem>>, vector<8x1xf32>,
    return
  }
  func.func @transform_0(%arg0: i32) -> (i32, i32) {
    %c0_i32 = arith.constant 0 : i32
    %c0_i32_0 = arith.constant 0 : i32
    return %arg0, %c0_i32 : i32, i32
  }
  func.func @transform_1(%arg0: i32) -> (i32, i32) {
    %c0_i32 = arith.constant 0 : i32
    %c0_i32_0 = arith.constant 0 : i32
    %c0_i32_1 = arith.constant 0 : i32
    return %c0_i32, %c0_i32_0 : i32, i32
  }
  func.func @transform_2(%arg0: i32) -> (i32, i32) {
    %c0_i32 = arith.constant 0 : i32
    %c0_i32_0 = arith.constant 0 : i32
    %c0_i32_1 = arith.constant 0 : i32
    return %c0_i32, %c0_i32_0 : i32, i32
  }
  func.func @transform_3(%arg0: i32) -> (i32, i32) {
    %c0_i32 = arith.constant 0 : i32
    %c0_i32_0 = arith.constant 0 : i32
    %c0_i32_1 = arith.constant 0 : i32
    return %c0_i32, %c0_i32_0 : i32, i32
  }
  func.func @transform_4(%arg0: i32) -> (i32, i32) {
    %c0_i32 = arith.constant 0 : i32
    %c0_i32_0 = arith.constant 0 : i32
    %c0_i32_1 = arith.constant 0 : i32
    return %c0_i32, %c0_i32_0 : i32, i32
  }
  func.func @transform_5(%arg0: i32) -> (i32, i32) {
    %c0_i32 = arith.constant 0 : i32
    %c0_i32_0 = arith.constant 0 : i32
    return %arg0, %c0_i32 : i32, i32
  }
}

</mosaic_0001>

<bundles_post_ra>
// kernel: tpu_custom_call.1
= control target key start
LH: loop header
LB: loop body
LE: loop exit
PB: predicated region body
PF: predicated region fallthrough
CT: control target
= control target key end

     0   :  { %vm51_vm0 = vcmask 31744   ;;  %v581_v3 = vmov 0   ;;  %vm350_vm1 = vcmask 261120   ;;  %vm559_vm6 = vcmask 7168   ;;  %s711_s0 = inlined_call_operand.vmem [shape: f32[8,4], index: 0, kind: input, shape index: {}]   ;;  %s712_s1 = inlined_call_operand.vmem [shape: f32[32,4], index: 1, kind: input, shape index: {}]   ;;  %s713_s2 = inlined_call_operand.vmem [shape: f32[32,1], index: 2, kind: input, shape index: {}]   ;;  %s714_s3 = inlined_call_operand.vmem [shape: f32[32,1], index: 3, kind: input, shape index: {}]   ;;  %s715_s4 = inlined_call_operand.<no memory space> [shape: f32[1,1], index: 4, kind: input, shape index: {}]   ;;  %s716_s5 = inlined_call_operand.vmem [shape: f32[8,2], index: 5, kind: output, shape index: {}]  }
   0x1   :  { %v22_v0 = vld [vmem:[%s711_s0] sm:$0xff]  ;;  %v24_v2 = vld [vmem:[%s712_s1 + $0x8] sm:$0xff]  ;;  %574 = vset.pattern.permute.xlu0 %v581_v3  ;;  %575 = vset.pattern.permute.xlu1 %v581_v3  ;;  %v25_v11 = vld [vmem:[%s712_s1 + $0x10] sm:$0xff]  ;;  %vm565_vm7 = vcmask 15368  }
   0x2   :  { %v23_v1 = vld [vmem:[%s712_s1] sm:$0xff]  ;;  %v65_v4 = vsel %vm51_vm0, %v22_v0, 0  ;;  %v56_v6 = vsel %vm51_vm0, %v24_v2, 0  ;;  %v59_v15 = vsel %vm51_vm0, %v25_v11, 0  ;;  %v28_v18 = vld [vmem:[%s713_s2 + $0x8] sm:$0xff]  ;;  %v29_v19 = vld [vmem:[%s713_s2 + $0x10] sm:$0xff] }
   0x3   :  { %v53_v5 = vsel %vm51_vm0, %v23_v1, 0  ;;  %v27_v7 = vld [vmem:[%s713_s2] sm:$0xff]  ;;  %v82_v8 = vand.u32 4294901760, %v65_v4  ;;  %v92_v10 = vand.u32 4294901760, %v56_v6  ;;  %v100_v23 = vand.u32 4294901760, %v59_v15  ;;  %43 = vperm.xlu1 %575, %v29_v19   ;;  %v26_v26 = vld [vmem:[%s712_s1 + $0x18] sm:$0xff] }
   0x4   :  { %v84_v9 = vand.u32 4294901760, %v53_v5  ;;  %33 = vperm.xlu0 %574, %v27_v7   ;;  %v62_v29 = vsel %vm51_vm0, %v26_v26, 0  ;;  %v30_v30 = vld [vmem:[%s713_s2 + $0x18] sm:$0xff]  ;;  %v312_v63 = vld [vmem:[%s714_s3 + $0x10] sm:$0xff]  ;;  %v311_v0 = vld [vmem:[%s714_s3 + $0x8] sm:$0xff] }
   0x5   :  { %v133_v12 = vsub.f32 %v65_v4, %v82_v8  ;;  %83 = vmatpush.xpose.msra.mxu0 %v82_v8  ;;  %210 = vmatpush.xpose.msra.mxu3 %v82_v8  ;;  %v93_v14 = vsub.f32 %v56_v6, %v92_v10  ;;  %v101_v28 = vsub.f32 %v59_v15, %v100_v23  ;;  %v108_v33 = vand.u32 4294901760, %v62_v29  ;;  %v313_v62 = vld [vmem:[%s714_s3 + $0x18] sm:$0xff] }
   0x6   :  { %v85_v13 = vsub.f32 %v53_v5, %v84_v9  ;;  %v654_v2 = vand.u32 4294901760, %v313_v62  ;;  %v656_v3 = vand.u32 4294901760, %v312_v63  ;;  %v658_v4 = vand.u32 4294901760, %v311_v0 }
   0x7   :  { %172 = vmatpush.xpose.msra.mxu2 %v133_v12  ;;  %v134_v17 = vand.u32 4294901760, %v133_v12  ;;  %v94_v22 = vand.u32 4294901760, %v93_v14  ;;  %v102_v32 = vand.u32 4294901760, %v101_v28  ;;  %v109_v35 = vsub.f32 %v62_v29, %v108_v33 }
   0x8   :  { %v86_v16 = vand.u32 4294901760, %v85_v13 }
   0x9   :  { %v135_v21 = vsub.f32 %v133_v12, %v134_v17  ;;  %254 = vmatpush.xpose.msrb.mxu0 %v134_v17  ;;  %v95_v27 = vsub.f32 %v93_v14, %v94_v22  ;;  %v103_v34 = vsub.f32 %v101_v28, %v102_v32  ;;  %v110_v37 = vand.u32 4294901760, %v109_v35 }
   0xa   :  { %v87_v20 = vsub.f32 %v85_v13, %v86_v16  ;;  %214 = vmatmul.f32.vlgmr.msra.gmra.mxu3 %v86_v16  ;;  %175 = vmatmul.f32.vlgmr.msra.gmra.mxu2 %v85_v13 }
   0xb   :  { %v136_v25 = vand.u32 4294901760, %v135_v21  ;;  %v96_v31 = vand.u32 4294901760, %v95_v27  ;;  %48 = vperm.xlu1 %575, %v30_v30   ;;  %v104_v36 = vand.u32 4294901760, %v103_v34  ;;  %v111_v38 = vsub.f32 %v109_v35, %v110_v37  ;;  %367 = vmatpush.msrb.mxu2 %v654_v2 }
   0xc   :  { %v88_v24 = vand.u32 4294901760, %v87_v20  ;;  %38 = vperm.xlu0 %574, %v28_v18  }
   0xd   :  { %137 = vmatpush.xpose.msra.mxu1 %v136_v25  ;;  %v112_v39 = vand.u32 4294901760, %v111_v38  ;;  %369 = vmatpush.msrb.mxu2 %v656_v3 }
   0xe   :  { %89 = vmatmul.f32.vlgmr.msra.gmra.mxu0 %v88_v24 }
   0xf   :  { %371 = vmatpush.msrb.mxu2 %v658_v4 }
  0x10   :  { %139 = vmatmul.f32.vlgmr.msra.gmra.mxu1 %v84_v9 }
  0x11   :  { %288 = vmatpush.xpose.msrb.mxu1 %v82_v8  ;;  %v662_v8 = vsub.f32 %v313_v62, %v654_v2 }
  0x12   :  { %220 = vmatmul.f32.gmra.mxu3 %v94_v22  ;;  %180 = vmatmul.f32.gmra.mxu2 %v93_v14 }
  0x13   :  { %v397_v12 = vand.u32 4294901760, %v662_v8 }
  0x15   :  { %v398_v19 = vsub.f32 %v662_v8, %v397_v12 }
  0x16   :  { %97 = vmatmul.f32.gmra.mxu0 %v96_v31 }
  0x17   :  { %v399_v25 = vand.u32 4294901760, %v398_v19 }
  0x18   :  { %143 = vmatmul.f32.gmra.mxu1 %v92_v10 }
  0x19   :  { %400 = vmatpush.msrb.mxu3 %v399_v25 }
  0x1a   :  { %226 = vmatmul.f32.gmra.mxu3 %v102_v32  ;;  %185 = vmatmul.f32.gmra.mxu2 %v101_v28 }
  0x1e   :  { %105 = vmatmul.f32.gmra.mxu0 %v104_v36 }
  0x20   :  { %147 = vmatmul.f32.gmra.mxu1 %v100_v23 }
  0x22   :  { %232 = vmatmul.f32.gmra.mxu3 %v110_v37  ;;  %190 = vmatmul.f32.gmra.mxu2 %v109_v35 }
  0x26   :  { %113 = vmatmul.f32.gmra.mxu0 %v112_v39 }
  0x28   :  { %151 = vmatmul.f32.gmra.mxu1 %v108_v33 }
  0x2e   :  { %256 = vmatmul.f32.vlgmr.msrb.gmra.mxu0 %v84_v9 }
  0x30   :  { %290 = vmatmul.f32.vlgmr.msrb.gmra.mxu1 %v84_v9  ;;  %v665_v9 = vsub.f32 %v312_v63, %v656_v3  ;;  %v10_v63 = vstv %s715_s4  ;;  %s582_s4 = smov 1  }
  0x31   :  { %11 = vst [vmem:[#allocation2] sm:$0x1] %v10_v63 }
  0x32   :  { %v403_v13 = vand.u32 4294901760, %v665_v9 }
  0x34   :  { %v404_v20 = vsub.f32 %v665_v9, %v403_v13 }
  0x36   :  { %260 = vmatmul.f32.gmra.mxu0 %v92_v10  ;;  %v405_v26 = vand.u32 4294901760, %v404_v20 }
  0x38   :  { %294 = vmatmul.f32.gmra.mxu1 %v92_v10  ;;  %v668_v10 = vsub.f32 %v311_v0, %v658_v4  ;;  %406 = vmatpush.msrb.mxu3 %v405_v26 }
  0x3a   :  { %v409_v14 = vand.u32 4294901760, %v668_v10 }
  0x3c   :  { %v410_v21 = vsub.f32 %v668_v10, %v409_v14 }
  0x3e   :  { %264 = vmatmul.f32.gmra.mxu0 %v100_v23  ;;  %v411_v31 = vand.u32 4294901760, %v410_v21 }
  0x40   :  { %298 = vmatmul.f32.gmra.mxu1 %v100_v23  ;;  %412 = vmatpush.msrb.mxu3 %v411_v31 }
  0x46   :  { %268 = vmatmul.f32.gmra.mxu0 %v108_v33 }
  0x48   :  { %302 = vmatmul.f32.gmra.mxu1 %v108_v33 }
  0x75   :  { %v44_v58 = vpop.permute.xlu1 %43 }
  0x76   :  { %v34_v44 = vpop.permute.xlu0 %33 }
  0x7d   :  { %v49_v22 = vpop.permute.xlu1 %48 }
  0x7e   :  { %v39_v51 = vpop.permute.xlu0 %38 }
  0x8b   :  { %v90_v40 = vpop.f32.mrf.mxu0 }
  0x8c   :  { %v91_v47 = vadd.f32 %v90_v40, %v34_v44 }
  0x8d   :  { %v140_v41 = vpop.f32.mrf.mxu1  ;;  %v176_v46 = vpop.f32.mrf.mxu2 }
  0x8e   :  { %v215_v49 = vpop.f32.mrf.mxu3  ;;  %v141_v50 = vadd.f32 %v140_v41, %v91_v47 }
  0x90   :  { %v177_v54 = vadd.f32 %v176_v46, %v141_v50  ;;  %v310_v50 = vld [vmem:[%s714_s3] sm:$0xff] }
  0x92   :  { %v216_v59 = vadd.f32 %v215_v49, %v177_v54 }
  0x93   :  { %v98_v42 = vpop.f32.mrf.mxu0 }
  0x94   :  { %v99_v53 = vadd.f32 %v98_v42, %v39_v51  ;;  %v372_v51 = vand.u32 4294901760, %v310_v50 }
  0x95   :  { %v144_v43 = vpop.f32.mrf.mxu1  ;;  %v181_v56 = vpop.f32.mrf.mxu2 }
  0x96   :  { %v145_v57 = vadd.f32 %v144_v43, %v99_v53  ;;  %v221_v60 = vpop.f32.mrf.mxu3  ;;  %373 = vmatpush.msrb.mxu2 %v372_v51 }
  0x98   :  { %v182_v5 = vadd.f32 %v181_v56, %v145_v57  ;;  %438 = vmatpush.msra.mxu2 %v662_v8 }
  0x9a   :  { %v222_v15 = vadd.f32 %v221_v60, %v182_v5  ;;  %441 = vmatpush.msra.mxu2 %v665_v9 }
  0x9b   :  { %v106_v45 = vpop.f32.mrf.mxu0 }
  0x9c   :  { %v107_v6 = vadd.f32 %v106_v45, %v44_v58  ;;  %444 = vmatpush.msra.mxu2 %v668_v10 }
  0x9d   :  { %v148_v48 = vpop.f32.mrf.mxu1  ;;  %v186_v16 = vpop.f32.mrf.mxu2 }
  0x9e   :  { %v149_v18 = vadd.f32 %v148_v48, %v107_v6  ;;  %v227_v27 = vpop.f32.mrf.mxu3 }
  0xa0   :  { %v187_v28 = vadd.f32 %v186_v16, %v149_v18 }
  0xa2   :  { %v228_v34 = vadd.f32 %v227_v27, %v187_v28 }
  0xa3   :  { %v114_v52 = vpop.f32.mrf.mxu0 }
  0xa4   :  { %v115_v29 = vadd.f32 %v114_v52, %v49_v22  ;;  %v414_v52 = vsub.f32 %v310_v50, %v372_v51 }
  0xa5   :  { %v152_v55 = vpop.f32.mrf.mxu1  ;;  %v191_v36 = vpop.f32.mrf.mxu2 }
  0xa6   :  { %v153_v35 = vadd.f32 %v152_v55, %v115_v29  ;;  %v233_v41 = vpop.f32.mrf.mxu3  ;;  %v415_v53 = vand.u32 4294901760, %v414_v52  ;;  %447 = vmatpush.msra.mxu2 %v414_v52 }
  0xa8   :  { %v192_v39 = vadd.f32 %v191_v36, %v153_v35  ;;  %v416_v54 = vsub.f32 %v414_v52, %v415_v53 }
  0xaa   :  { %v234_v44 = vadd.f32 %v233_v41, %v192_v39  ;;  %v417_v55 = vand.u32 4294901760, %v416_v54 }
  0xab   :  { %v257_v61 = vpop.f32.mrf.mxu0 }
  0xac   :  { %v258_v1 = vadd.f32 %v257_v61, %v216_v59  ;;  %418 = vmatpush.msrb.mxu3 %v417_v55 }
  0xad   :  { %v291_v7 = vpop.f32.mrf.mxu1 }
  0xae   :  { %v292_v11 = vadd.f32 %v291_v7, %v258_v1  ;;  %467 = vmatpush.msra.mxu3 %v654_v2 }
  0xb0   :  { %v306_v17 = vmax.f32 %v292_v11, 0.0  ;;  %469 = vmatpush.msra.mxu3 %v656_v3 }
  0xb2   :  { %318 = vxpose.xlu2.b32.start [1/4] (short) (narrow) %v306_v17, 8  ;;  %471 = vmatpush.msra.mxu3 %v658_v4 }
  0xb3   :  { %v261_v23 = vpop.f32.mrf.mxu0 }
  0xb4   :  { %v262_v24 = vadd.f32 %v261_v23, %v222_v15  ;;  %473 = vmatpush.msra.mxu3 %v372_v51 }
  0xb5   :  { %v295_v30 = vpop.f32.mrf.mxu1 }
  0xb6   :  { %v296_v32 = vadd.f32 %v295_v30, %v262_v24 }
  0xb8   :  { %v307_v33 = vmax.f32 %v296_v32, 0.0 }
  0xba   :  { %319 = vxpose.xlu2.b32.cont [2/4] (short) (narrow) %v307_v33, 8 }
  0xbb   :  { %v265_v37 = vpop.f32.mrf.mxu0 }
  0xbc   :  { %v266_v38 = vadd.f32 %v265_v37, %v228_v34 }
  0xbd   :  { %v299_v40 = vpop.f32.mrf.mxu1 }
  0xbe   :  { %v300_v42 = vadd.f32 %v299_v40, %v266_v38 }
  0xc0   :  { %v308_v43 = vmax.f32 %v300_v42, 0.0 }
  0xc2   :  { %320 = vxpose.xlu2.b32.cont [3/4] (short) (narrow) %v308_v43, 8 }
  0xc3   :  { %v269_v45 = vpop.f32.mrf.mxu0 }
  0xc4   :  { %v270_v46 = vadd.f32 %v269_v45, %v234_v44 }
  0xc5   :  { %v303_v47 = vpop.f32.mrf.mxu1 }
  0xc6   :  { %v304_v48 = vadd.f32 %v303_v47, %v270_v46 }
  0xc8   :  { %v309_v49 = vmax.f32 %v304_v48, 0.0 }
  0xca   :  { %321 = vxpose.xlu2.b32.end [4/4] (short) (narrow) %v309_v49, 8 }
 0x14b   :  { %v334_v56 = vpop.trf.xlu2 }
 0x14c   :  { %v352_v57 = vsel %vm350_vm1, %v334_v56, 0 }
 0x14d   :  { %v374_v58 = vand.u32 4294901760, %v352_v57 }
 0x14f   :  { %v375_v59 = vsub.f32 %v352_v57, %v374_v58  ;;  %420 = vmatmul.f32.vlgmr.msrb.gmra.mxu3 %v374_v58 }
 0x150   :  { %527 = vmatpush.msrb.mxu3 %v654_v2  ;;  %v576_v2 = vld [vmem:[#allocation2] ss:$0 sm:$0xff] }
 0x151   :  { %v376_v60 = vand.u32 4294901760, %v375_v59 }
 0x152   :  { %529 = vmatpush.msrb.mxu3 %v656_v3 }
 0x153   :  { %v377_v61 = vsub.f32 %v375_v59, %v376_v60 }
 0x154   :  { %531 = vmatpush.msrb.mxu3 %v658_v4 }
 0x155   :  { %v378_v62 = vand.u32 4294901760, %v377_v61 }
 0x156   :  { %533 = vmatpush.msrb.mxu3 %v372_v51 }
 0x157   :  { %379 = vmatmul.f32.vlgmr.msrb.gmra.mxu2 %v378_v62  ;;  %477 = vmatmul.f32.vlgmr.msra.gmra.mxu3 %v376_v60 }
 0x158   :  { %496 = vmatpush.msrb.mxu2 %v397_v12 }
 0x15a   :  { %500 = vmatpush.msrb.mxu2 %v403_v13 }
 0x15c   :  { %504 = vmatpush.msrb.mxu2 %v409_v14 }
 0x15e   :  { %508 = vmatpush.msrb.mxu2 %v415_v53 }
 0x15f   :  { %450 = vmatmul.f32.vlgmr.msra.gmra.mxu2 %v375_v59  ;;  %535 = vmatmul.f32.vlgmr.msrb.gmra.mxu3 %v374_v58 }
 0x167   :  { %510 = vmatmul.f32.vlgmr.msrb.gmra.mxu2 %v374_v58 }
 0x1d2   :  { %v421_v0 = vpop.f32.mrf.mxu3 }
 0x1da   :  { %v380_v1 = vpop.f32.mrf.mxu2  ;;  %v478_v4 = vpop.f32.mrf.mxu3 }
 0x1db   :  { %v381_v3 = vadd.f32 %v576_v2, %v380_v1 }
 0x1dd   :  { %v422_v6 = vadd.f32 %v421_v0, %v381_v3 }
 0x1e2   :  { %v451_v5 = vpop.f32.mrf.mxu2  ;;  %v536_v11 = vpop.f32.mrf.mxu3 }
 0x1e3   :  { %v452_v7 = vadd.f32 %v451_v5, %v422_v6 }
 0x1e5   :  { %v479_v8 = vadd.f32 %v478_v4, %v452_v7 }
 0x1ea   :  { %v511_v9 = vpop.f32.mrf.mxu2 }
 0x1eb   :  { %v512_v10 = vadd.f32 %v511_v9, %v479_v8 }
 0x1ed   :  { %v537_v12 = vadd.f32 %v536_v11, %v512_v10 }
 0x1ef   :  { %v539_v13 = vsub.f32 0.0, %v537_v12 }
 0x1f1   :  { %v540_v14 = vmul.f32 1.442695, %v539_v13 }
 0x1f3   :  { %577 = vpow2.f32 %v540_v14 }
 0x1f9   :  { %v578_v15 = vpop.eup %577 }
 0x1fa   :  { %v542_v16 = vadd.f32 1.0, %v578_v15 }
 0x1fc   :  { %579 = vrcp.f32 %v542_v16  ;;  %v554_v20 = vand.u32 2147483648, %v542_v16  ;;  %v552_v22 = vand.u32 2147483647, %v542_v16  ;;  %vm548_vm3 = vweird.f32 %v542_v16 }
 0x1fe   :  { %v555_v24 = vor.u32 1.1754944e-38, %v554_v20  ;;  %vm553_vm5 = vcmp.eq.f32.partialorder %v552_v22, 8.507059e+37 }
 0x202   :  { %v580_v17 = vpop.eup %579 }
 0x203   :  { %v544_v18 = vmul.f32 %v580_v17, %v542_v16  ;;  %vm549_vm2 = vweird.f32 %v580_v17 }
 0x204   :  { %vm550_vm4 = vmor %vm548_vm3, %vm549_vm2 }
 0x205   :  { %v545_v19 = vsub.f32 1.0, %v544_v18 }
 0x207   :  { %v546_v21 = vmul.f32 %v580_v17, %v545_v19 }
 0x209   :  { %v547_v23 = vadd.f32 %v580_v17, %v546_v21 }
 0x20b   :  { %v551_v25 = vsel %vm550_vm4, %v580_v17, %v547_v23 }
 0x20c   :  { %v556_v26 = vsel %vm553_vm5, %v555_v24, %v551_v25 }
 0x20d   :  { %562 = vrot.lane.b32.xlu0 %v556_v26, %s582_s4  ;;  %v558_v27 = vsub.f32 1.0, %v556_v26 }
 0x20f   :  { %560 = vst.msk [vmem:[%s716_s5] sm:$0xff] %vm559_vm6, %v558_v27 }
 0x27f   :  { %v563_v28 = vpop.permute.xlu0 %562 }
 0x280   :  { %566 = vst.msk [vmem:[%s716_s5] sm:$0xff] %vm565_vm7, %v563_v28 }

</bundles_post_ra>
